<compile_context>
chip_gen: v6e
topology: v6e:2x2x1
jax: 0.10.0
libtpu: 0.0.40
codegen_flags: <defaults>
</compile_context>

<pallas_src>
import jax
import jax.numpy as jnp
from jax.experimental import pallas as pl
from jax.experimental.pallas import tpu as pltpu

_LANE = 128
_TS_MAX_DEFAULT = 512  # sublane-rows per tile: 512*128 px -> ~9 MiB dbl-buffered


def _apply_coeffs_kernel(coeff_ref, x_ref, o_ref):
    # coeff_ref: (1, 12, TS, 128)   x_ref: (1, 3, TS, 128)   o_ref: (1, 3, TS, 128)
    # Channel-at-a-time reads keep live data to a few (TS, 128) planes.
    x0 = x_ref[0, 0, :, :].astype(jnp.float32)
    x1 = x_ref[0, 1, :, :].astype(jnp.float32)
    x2 = x_ref[0, 2, :, :].astype(jnp.float32)
    for oc in range(3):
        base = 4 * oc
        acc = (x0 * coeff_ref[0, base + 0, :, :].astype(jnp.float32)
               + x1 * coeff_ref[0, base + 1, :, :].astype(jnp.float32)
               + x2 * coeff_ref[0, base + 2, :, :].astype(jnp.float32)
               + coeff_ref[0, base + 3, :, :].astype(jnp.float32))
        o_ref[0, oc, :, :] = acc.astype(o_ref.dtype)


def _pick_tile_rows(rows, ts_max):
    """Return (TS, rows_pad): TS rows per tile, rows padded to a multiple of TS."""
    if rows <= ts_max:
        # Full extent in one tile (block dim == array dim, so no /8 constraint).
        return rows, rows
    ts_max8 = max(8, ts_max - ts_max % 8)
    # Prefer a divisor of `rows` that is a multiple of 8 -> no padding needed.
    for ts in range(ts_max8, max(8, ts_max8 // 8) - 1, -8):
        if rows % ts == 0:
            return ts, rows
    # Fall back to padding up to a multiple of ts_max8.
    rows_pad = -(-rows // ts_max8) * ts_max8
    return ts_max8, rows_pad


def apply_coeffs(coeff, full_res_input, *, tile_rows_max=_TS_MAX_DEFAULT):
    """coeff: [N, 12, H, W], full_res_input: [N, 3, H, W] -> [N, 3, H, W]."""
    N, C12, H, W = coeff.shape
    assert C12 == 12, "coeff must have 12 channels"
    assert full_res_input.shape == (N, 3, H, W)

    HW = H * W
    rows = -(-HW // _LANE)                      # number of 128-lane rows
    TS, rows_pad = _pick_tile_rows(rows, tile_rows_max)
    hw_pad = rows_pad * _LANE

    coeff_f = coeff.reshape(N, 12, HW)
    x_f = full_res_input.reshape(N, 3, HW)
    if hw_pad != HW:
        pad = ((0, 0), (0, 0), (0, hw_pad - HW))
        coeff_f = jnp.pad(coeff_f, pad)
        x_f = jnp.pad(x_f, pad)
    coeff_f = coeff_f.reshape(N, 12, rows_pad, _LANE)
    x_f = x_f.reshape(N, 3, rows_pad, _LANE)

    grid = (N, rows_pad // TS)

    out = pl.pallas_call(
        _apply_coeffs_kernel,
        out_shape=jax.ShapeDtypeStruct((N, 3, rows_pad, _LANE),
                                       full_res_input.dtype),
        grid_spec=pltpu.PrefetchScalarGridSpec(
            num_scalar_prefetch=0,
            grid=grid,
            in_specs=[
                pl.BlockSpec((1, 12, TS, _LANE), lambda n, t: (n, 0, t, 0)),
                pl.BlockSpec((1, 3, TS, _LANE), lambda n, t: (n, 0, t, 0)),
            ],
            out_specs=pl.BlockSpec((1, 3, TS, _LANE), lambda n, t: (n, 0, t, 0)),
        ),
        compiler_params=pltpu.CompilerParams(
            dimension_semantics=("parallel", "parallel"),
        ),
    )(coeff_f, x_f)

    return out.reshape(N, 3, hw_pad)[:, :, :HW].reshape(N, 3, H, W)


def _reference(coeff, x):
    r = jnp.sum(x * coeff[:, 0:3], axis=1, keepdims=True) + coeff[:, 3:4]
    g = jnp.sum(x * coeff[:, 4:7], axis=1, keepdims=True) + coeff[:, 7:8]
    b = jnp.sum(x * coeff[:, 8:11], axis=1, keepdims=True) + coeff[:, 11:12]
    return jnp.concatenate([r, g, b], axis=1)


def _run_case(key, N, H, W, tile_rows_max=_TS_MAX_DEFAULT):
    k1, k2 = jax.random.split(key)
    coeff = jax.random.normal(k1, (N, 12, H, W), dtype=jnp.float32)
    x = jax.random.normal(k2, (N, 3, H, W), dtype=jnp.float32)
    out = apply_coeffs(coeff, x, tile_rows_max=tile_rows_max)
    out = jax.block_until_ready(out)
    ref = _reference(coeff, x)
    assert out.shape == (N, 3, H, W)
    assert jnp.allclose(out, ref, atol=1e-5, rtol=1e-5)


if __name__ == "__main__":
    key = jax.random.PRNGKey(0)
    keys = jax.random.split(key, 3)

    # Small lane-aligned case (HW = 256, single tile).
    _run_case(keys[0], N=2, H=16, W=16)
    # Non-128-multiple HW (HW = 480) -> exercises the padding path.
    _run_case(keys[1], N=2, H=20, W=24)
    # Multi-tile spatial grid (rows = 32, TS = 8 -> grid (2, 4)).
    _run_case(keys[2], N=2, H=64, W=64, tile_rows_max=8)

    print("KERNEL_OK")
</pallas_src>

<mosaic_0001>
module attributes {stable_mosaic.version = 11 : i64} {
  func.func @_apply_coeffs_kernel(%arg0: i32, %arg1: i32, %arg2: memref<1x12x2x128xf32, #tpu.memory_space<vmem>>, %arg3: memref<1x3x2x128xf32, #tpu.memory_space<vmem>>, %arg4: memref<1x3x2x128xf32, #tpu.memory_space<vmem>>) attributes {dimension_semantics = [#tpu.dimension_semantics<parallel>, #tpu.dimension_semantics<parallel>], iteration_bounds = array<i64: 2, 1>, scalar_prefetch = 0 : i64, scratch_operands = 0 : i64, tpu.core_type = #tpu.core_type<tc>, window_params = [{transform_indices = @transform_0, window_bounds = array<i64: 1, 12, 2, 128>}, {transform_indices = @transform_1, window_bounds = array<i64: 1, 3, 2, 128>}, {transform_indices = @transform_2, window_bounds = array<i64: 1, 3, 2, 128>}]} {
    %c0 = arith.constant 0 : index
    %c0_0 = arith.constant 0 : index
    %c0_1 = arith.constant 0 : index
    %c0_2 = arith.constant 0 : index
    %0 = vector.load %arg3[%c0, %c0_0, %c0_1, %c0_2] : memref<1x3x2x128xf32, #tpu.memory_space<vmem>>, vector<1x1x2x128xf32>
    %1 = vector.shape_cast %0 : vector<1x1x2x128xf32> to vector<2x128xf32>
    %c0_3 = arith.constant 0 : index
    %c1 = arith.constant 1 : index
    %c0_4 = arith.constant 0 : index
    %c0_5 = arith.constant 0 : index
    %2 = vector.load %arg3[%c0_3, %c1, %c0_4, %c0_5] : memref<1x3x2x128xf32, #tpu.memory_space<vmem>>, vector<1x1x2x128xf32>
    %3 = vector.shape_cast %2 : vector<1x1x2x128xf32> to vector<2x128xf32>
    %c0_6 = arith.constant 0 : index
    %c2 = arith.constant 2 : index
    %c0_7 = arith.constant 0 : index
    %c0_8 = arith.constant 0 : index
    %4 = vector.load %arg3[%c0_6, %c2, %c0_7, %c0_8] : memref<1x3x2x128xf32, #tpu.memory_space<vmem>>, vector<1x1x2x128xf32>
    %5 = vector.shape_cast %4 : vector<1x1x2x128xf32> to vector<2x128xf32>
    %c0_9 = arith.constant 0 : index
    %c0_10 = arith.constant 0 : index
    %c0_11 = arith.constant 0 : index
    %c0_12 = arith.constant 0 : index
    %6 = vector.load %arg2[%c0_9, %c0_10, %c0_11, %c0_12] : memref<1x12x2x128xf32, #tpu.memory_space<vmem>>, vector<1x1x2x128xf32>
    %7 = vector.shape_cast %6 : vector<1x1x2x128xf32> to vector<2x128xf32>
    %8 = arith.mulf %1, %7 : vector<2x128xf32>
    %c0_13 = arith.constant 0 : index
    %c1_14 = arith.constant 1 : index
    %c0_15 = arith.constant 0 : index
    %c0_16 = arith.constant 0 : index
    %9 = vector.load %arg2[%c0_13, %c1_14, %c0_15, %c0_16] : memref<1x12x2x128xf32, #tpu.memory_space<vmem>>, vector<1x1x2x128xf32>
    %10 = vector.shape_cast %9 : vector<1x1x2x128xf32> to vector<2x128xf32>
    %11 = arith.mulf %3, %10 : vector<2x128xf32>
    %12 = arith.addf %8, %11 : vector<2x128xf32>
    %c0_17 = arith.constant 0 : index
    %c2_18 = arith.constant 2 : index
    %c0_19 = arith.constant 0 : index
    %c0_20 = arith.constant 0 : index
    %13 = vector.load %arg2[%c0_17, %c2_18, %c0_19, %c0_20] : memref<1x12x2x128xf32, #tpu.memory_space<vmem>>, vector<1x1x2x128xf32>
    %14 = vector.shape_cast %13 : vector<1x1x2x128xf32> to vector<2x128xf32>
    %15 = arith.mulf %5, %14 : vector<2x128xf32>
    %16 = arith.addf %12, %15 : vector<2x128xf32>
    %c0_21 = arith.constant 0 : index
    %c3 = arith.constant 3 : index
    %c0_22 = arith.constant 0 : index
    %c0_23 = arith.constant 0 : index
    %17 = vector.load %arg2[%c0_21, %c3, %c0_22, %c0_23] : memref<1x12x2x128xf32, #tpu.memory_space<vmem>>, vector<1x1x2x128xf32>
    %18 = vector.shape_cast %17 : vector<1x1x2x128xf32> to vector<2x128xf32>
    %19 = arith.addf %16, %18 : vector<2x128xf32>
    %c0_24 = arith.constant 0 : index
    %c0_25 = arith.constant 0 : index
    %c0_26 = arith.constant 0 : index
    %c0_27 = arith.constant 0 : index
    %20 = vector.load %arg4[%c0_24, %c0_25, %c0_26, %c0_27] : memref<1x3x2x128xf32, #tpu.memory_space<vmem>>, vector<1x1x2x128xf32>
    %21 = vector.shape_cast %20 : vector<1x1x2x128xf32> to vector<2x128xf32>
    %22 = vector.shape_cast %19 : vector<2x128xf32> to vector<1x1x2x128xf32>
    tpu.vector_store %arg4[%c0_24, %c0_25, %c0_26, %c0_27], %22 {strides = array<i32>} : memref<1x3x2x128xf32, #tpu.memory_space<vmem>>, vector<1x1x2x128xf32>,
    %c0_28 = arith.constant 0 : index
    %c4 = arith.constant 4 : index
    %c0_29 = arith.constant 0 : index
    %c0_30 = arith.constant 0 : index
    %23 = vector.load %arg2[%c0_28, %c4, %c0_29, %c0_30] : memref<1x12x2x128xf32, #tpu.memory_space<vmem>>, vector<1x1x2x128xf32>
    %24 = vector.shape_cast %23 : vector<1x1x2x128xf32> to vector<2x128xf32>
    %25 = arith.mulf %1, %24 : vector<2x128xf32>
    %c0_31 = arith.constant 0 : index
    %c5 = arith.constant 5 : index
    %c0_32 = arith.constant 0 : index
    %c0_33 = arith.constant 0 : index
    %26 = vector.load %arg2[%c0_31, %c5, %c0_32, %c0_33] : memref<1x12x2x128xf32, #tpu.memory_space<vmem>>, vector<1x1x2x128xf32>
    %27 = vector.shape_cast %26 : vector<1x1x2x128xf32> to vector<2x128xf32>
    %28 = arith.mulf %3, %27 : vector<2x128xf32>
    %29 = arith.addf %25, %28 : vector<2x128xf32>
    %c0_34 = arith.constant 0 : index
    %c6 = arith.constant 6 : index
    %c0_35 = arith.constant 0 : index
    %c0_36 = arith.constant 0 : index
    %30 = vector.load %arg2[%c0_34, %c6, %c0_35, %c0_36] : memref<1x12x2x128xf32, #tpu.memory_space<vmem>>, vector<1x1x2x128xf32>
    %31 = vector.shape_cast %30 : vector<1x1x2x128xf32> to vector<2x128xf32>
    %32 = arith.mulf %5, %31 : vector<2x128xf32>
    %33 = arith.addf %29, %32 : vector<2x128xf32>
    %c0_37 = arith.constant 0 : index
    %c7 = arith.constant 7 : index
    %c0_38 = arith.constant 0 : index
    %c0_39 = arith.constant 0 : index
    %34 = vector.load %arg2[%c0_37, %c7, %c0_38, %c0_39] : memref<1x12x2x128xf32, #tpu.memory_space<vmem>>, vector<1x1x2x128xf32>
    %35 = vector.shape_cast %34 : vector<1x1x2x128xf32> to vector<2x128xf32>
    %36 = arith.addf %33, %35 : vector<2x128xf32>
    %c0_40 = arith.constant 0 : index
    %c1_41 = arith.constant 1 : index
    %c0_42 = arith.constant 0 : index
    %c0_43 = arith.constant 0 : index
    %37 = vector.load %arg4[%c0_40, %c1_41, %c0_42, %c0_43] : memref<1x3x2x128xf32, #tpu.memory_space<vmem>>, vector<1x1x2x128xf32>
    %38 = vector.shape_cast %37 : vector<1x1x2x128xf32> to vector<2x128xf32>
    %39 = vector.shape_cast %36 : vector<2x128xf32> to vector<1x1x2x128xf32>
    tpu.vector_store %arg4[%c0_40, %c1_41, %c0_42, %c0_43], %39 {strides = array<i32>} : memref<1x3x2x128xf32, #tpu.memory_space<vmem>>, vector<1x1x2x128xf32>,
    %c0_44 = arith.constant 0 : index
    %c8 = arith.constant 8 : index
    %c0_45 = arith.constant 0 : index
    %c0_46 = arith.constant 0 : index
    %40 = vector.load %arg2[%c0_44, %c8, %c0_45, %c0_46] : memref<1x12x2x128xf32, #tpu.memory_space<vmem>>, vector<1x1x2x128xf32>
    %41 = vector.shape_cast %40 : vector<1x1x2x128xf32> to vector<2x128xf32>
    %42 = arith.mulf %1, %41 : vector<2x128xf32>
    %c0_47 = arith.constant 0 : index
    %c9 = arith.constant 9 : index
    %c0_48 = arith.constant 0 : index
    %c0_49 = arith.constant 0 : index
    %43 = vector.load %arg2[%c0_47, %c9, %c0_48, %c0_49] : memref<1x12x2x128xf32, #tpu.memory_space<vmem>>, vector<1x1x2x128xf32>
    %44 = vector.shape_cast %43 : vector<1x1x2x128xf32> to vector<2x128xf32>
    %45 = arith.mulf %3, %44 : vector<2x128xf32>
    %46 = arith.addf %42, %45 : vector<2x128xf32>
    %c0_50 = arith.constant 0 : index
    %c10 = arith.constant 10 : index
    %c0_51 = arith.constant 0 : index
    %c0_52 = arith.constant 0 : index
    %47 = vector.load %arg2[%c0_50, %c10, %c0_51, %c0_52] : memref<1x12x2x128xf32, #tpu.memory_space<vmem>>, vector<1x1x2x128xf32>
    %48 = vector.shape_cast %47 : vector<1x1x2x128xf32> to vector<2x128xf32>
    %49 = arith.mulf %5, %48 : vector<2x128xf32>
    %50 = arith.addf %46, %49 : vector<2x128xf32>
    %c0_53 = arith.constant 0 : index
    %c11 = arith.constant 11 : index
    %c0_54 = arith.constant 0 : index
    %c0_55 = arith.constant 0 : index
    %51 = vector.load %arg2[%c0_53, %c11, %c0_54, %c0_55] : memref<1x12x2x128xf32, #tpu.memory_space<vmem>>, vector<1x1x2x128xf32>
    %52 = vector.shape_cast %51 : vector<1x1x2x128xf32> to vector<2x128xf32>
    %53 = arith.addf %50, %52 : vector<2x128xf32>
    %c0_56 = arith.constant 0 : index
    %c2_57 = arith.constant 2 : index
    %c0_58 = arith.constant 0 : index
    %c0_59 = arith.constant 0 : index
    %54 = vector.load %arg4[%c0_56, %c2_57, %c0_58, %c0_59] : memref<1x3x2x128xf32, #tpu.memory_space<vmem>>, vector<1x1x2x128xf32>
    %55 = vector.shape_cast %54 : vector<1x1x2x128xf32> to vector<2x128xf32>
    %56 = vector.shape_cast %53 : vector<2x128xf32> to vector<1x1x2x128xf32>
    tpu.vector_store %arg4[%c0_56, %c2_57, %c0_58, %c0_59], %56 {strides = array<i32>} : memref<1x3x2x128xf32, #tpu.memory_space<vmem>>, vector<1x1x2x128xf32>,
    return
  }
  func.func @transform_0(%arg0: i32, %arg1: i32) -> (i32, i32, i32, i32) {
    %c0_i32 = arith.constant 0 : i32
    %c0_i32_0 = arith.constant 0 : i32
    %c0_i32_1 = arith.constant 0 : i32
    return %arg0, %c0_i32, %arg1, %c0_i32_0 : i32, i32, i32, i32
  }
  func.func @transform_1(%arg0: i32, %arg1: i32) -> (i32, i32, i32, i32) {
    %c0_i32 = arith.constant 0 : i32
    %c0_i32_0 = arith.constant 0 : i32
    %c0_i32_1 = arith.constant 0 : i32
    return %arg0, %c0_i32, %arg1, %c0_i32_0 : i32, i32, i32, i32
  }
  func.func @transform_2(%arg0: i32, %arg1: i32) -> (i32, i32, i32, i32) {
    %c0_i32 = arith.constant 0 : i32
    %c0_i32_0 = arith.constant 0 : i32
    %c0_i32_1 = arith.constant 0 : i32
    return %arg0, %c0_i32, %arg1, %c0_i32_0 : i32, i32, i32, i32
  }
}

</mosaic_0001>

<bundles_post_ra>
// kernel: tpu_custom_call.1
= control target key start
LH: loop header
LB: loop body
LE: loop exit
PB: predicated region body
PF: predicated region fallthrough
CT: control target
= control target key end

     0   :  { %7 = vsyncpa [#allocation3], 0  ;;  %s859_s0 = inlined_call_operand.hbm [shape: f32[2,12,2,128], index: 0, kind: input, shape index: {}]   ;;  %s860_s1 = inlined_call_operand.hbm [shape: f32[2,3,2,128], index: 1, kind: input, shape index: {}]   ;;  %s861_s2 = inlined_call_operand.hbm [shape: f32[2,3,2,128], index: 2, kind: output, shape index: {}]  }
   0x1   :  { %9 = vsyncpa [#allocation3 + $0x1], 0 }
   0x2   :  { %10 = vsyncpa [#allocation6], 0 }
   0x3   :  { %12 = vsyncpa [#allocation6 + $0x1], 0 }
   0x4   :  { %13 = vsyncpa [#allocation4], 0 }
   0x5   :  { %15 = vsyncpa [#allocation4 + $0x1], 0  ;;  %s665_s9 = smov 0   ;;  %s667_s10 = smov 0  }
   0x6   :  { %s669_s11 = smov 0   ;;  %s671_s12 = smov 0  }
   0x7   :  { %s673_s13 = smov 0   ;;  %s675_s14 = smov 0  }
   0x8 LB: > { %s398_s15 = sadd.s32 4294967295, %s641_s14   ;;  %s399_s16 = sadd.s32 4294967294, %s641_s14   ;;  %s641_s14 = sphi %s675_s14, %s21_s14   ;;  %s637_s13 = sphi %s673_s13, %s872_s13   ;;  %s633_s12 = sphi %s671_s12, %s871_s12   ;;  %s629_s11 = sphi %s669_s11, %s870_s11   ;;  %s625_s10 = sphi %s667_s10, %s869_s10   ;;  %s621_s9 = sphi %s665_s9, %s868_s9  }
   0x9   : > { %s33_s17 = sadd.s32 1, %s637_s13  ;;  %s42_s18 = sadd.s32 1, %s629_s11 }
   0xa   : > { %p35_p0 = scmp.ge.s32.totalorder %s33_s17, 2  ;;  %p49_p1 = scmp.ne.s32.totalorder %s629_s11, %s625_s10 }
   0xb   : > { %p50_p2 = scmp.eq.s32.totalorder %s641_s14, 0  ;;  %p55_p3 = scmp.ne.s32.totalorder %s625_s10, %s621_s9 }
   0xc   : > { %s874_s17 = smov (%p35_p0, %s33_s17), 0  ;;  %p56_p5 = scmp.eq.s32.totalorder %s398_s15, 0 }
   0xd   : > { %p706_p4 = por %p50_p2, %p49_p1  ;;  %s37_s20 = ssub.s32 %s637_s13, %s874_s17 }
   0xe   : > { %p109_p6 = scmp.eq.s32.totalorder %s398_s15, 1  ;;  %p40_p7 = scmp.eq.s32.totalorder %s37_s20, 0 }
   0xf   : > { %p712_p8 = por %p56_p5, %p55_p3  ;;  %p115_p10 = scmp.eq.s32.totalorder %s399_s16, 1 }
  0x10   : > { %p716_p9 = por %p109_p6, %p49_p1  ;;  %p401_p12 = scmp.ge.s32.totalorder %s641_s14, 2 }
  0x11   : > { %s721_s23 = scalar_select %p40_p7, %s629_s11, %s42_s18  }
  0x12   : > { %p723_p11 = por %p115_p10, %p55_p3  ;;  %p447_p13 = scmp.lt.s32.totalorder %s641_s14, 2 }
  0x13   : > { %s730_s25 = sand.u32 1, %s629_s11   ;;  %s424_s27 = smul.u32 384, %s637_s13 }
  0x14   : > { %s423_s26 = smul.u32 24, %s730_s25  ;;  %p736_p0 = pnand %p447_p13, %p706_p4 }
  0x15   : > { %s146_s3 = scalar_lea.hbm %s859_s0, %s424_s27  ;;  %p404_p1 = scmp.ge.s32.totalorder %s641_s14, 1 }
  0x16   : > { %s139_s4 = scalar_lea.vmem [#allocation2], %s423_s26  ;;  %s136_s6 = scalar_lea.sflag [#allocation3], %s730_s25 }
  0x17   : > { %s147_s5 = sshll.u32 %s139_s4, 4  ;;  %p503_p2 = pneg %p736_p0  ;;  %s148_s5 = int_to_ptr.vmem [resolvable:$true] %s147_s5 }
  0x18   : > { %s514_s7 = scalar_lea.vmem %s148_s5, 384  ;;  %s643_s8 = smov [#allocation2]  }
  0x19   : > { %p515_p3 = scmp.ne.s32.totalorder %s148_s5, %s514_s7  ;;  %s519_s15 = sshll.u32 %s643_s8, 4  ;;  %s520_s15 = int_to_ptr.vmem [resolvable:$false] %s519_s15 }
  0x1a   : > { %s521_s16 = scalar_lea.vmem %s520_s15, 768  ;;  %p522_p6 = scmp.lt.s32.totalorder %s148_s5, %s520_s15 }
  0x1b   : > { %p517_p4 = pnand %p515_p3, %p503_p2  ;;  %p523_p7 = scmp.lt.s32.totalorder %s521_s16, %s514_s7 }
  0x1d   : > { %p518_p5 = pneg %p517_p4  ;;  %p524_p10 = por %p523_p7, %p522_p6 }
  0x1f   : > { %p525_p13 = pnand %p524_p10, %p518_p5 }
  0x21   : > { %528 = shalt.err (!%p525_p13)
}
  0x22   : > { %s644_s18 = smov 32   ;;  %s645_s19 = smov 2  }
  0x23   : > { %439 = dma.hbm_to_vmem [thread:$0]  (!%p736_p0), %s146_s3, 384, %s148_s5, %s136_s6, %s644_s18, %s644_s18, %s645_s19  }
  0x24   : > { %p177_p3 = scmp.lt.s32.totalorder %s641_s14, 3  ;;  %s425_s20 = smul.u32 6, %s730_s25 }
  0x25   : > { %s426_s27 = smul.u32 96, %s637_s13  ;;  %s158_s15 = scalar_lea.sflag [#allocation6], %s730_s25 }
  0x26   : > { %p756_p4 = pnand %p404_p1, %p177_p3  ;;  %s161_s7 = scalar_lea.vmem [#allocation5], %s425_s20 }
  0x27   : > { %s168_s4 = scalar_lea.hbm %s860_s1, %s426_s27  ;;  %s169_s8 = sshll.u32 %s161_s7, 4  ;;  %s170_s8 = int_to_ptr.vmem [resolvable:$true] %s169_s8 }
  0x28   : > { %s542_s16 = scalar_lea.vmem %s170_s8, 96  ;;  %s646_s3 = smov [#allocation5]  }
  0x29   : > { %p543_p5 = scmp.ne.s32.totalorder %s170_s8, %s542_s16  ;;  %s547_s5 = sshll.u32 %s646_s3, 4  ;;  %s548_s5 = int_to_ptr.vmem [resolvable:$false] %s547_s5 }
  0x2a   : > { %s549_s6 = scalar_lea.vmem %s548_s5, 192  ;;  %p550_p1 = scmp.lt.s32.totalorder %s170_s8, %s548_s5 }
  0x2b   : > { %p545_p6 = pnand %p543_p5, %p503_p2  ;;  %p551_p10 = scmp.lt.s32.totalorder %s549_s6, %s542_s16 }
  0x2d   : > { %p546_p7 = pneg %p545_p6  ;;  %p552_p13 = por %p551_p10, %p550_p1 }
  0x2f   : > { %p553_p3 = pnand %p552_p13, %p546_p7 }
  0x31   : > { %556 = shalt.err (!%p553_p3)
}
  0x32   : > { %442 = dma.hbm_to_vmem [thread:$0]  (!%p736_p0), %s168_s4, 96, %s170_s8, %s158_s15, %s644_s18, %s644_s18, %s645_s19  }
  0x33   : > { %181 = sbr.rel (%p756_p4) target bundleno = 91 (0x5b), region = 28  ;;  %s773_s25 = sand.u32 (!%p756_p4), 1, %s625_s10  }
  0x34   : > { %s427_s20 = smul.u32 (!%p756_p4), 24, %s773_s25  ;;  %s184_s27 = scalar_lea.sflag (!%p756_p4), [#allocation3], %s773_s25 }
  0x36   : > { %s777_s29 = scalar_lea.vmem (!%p756_p4), [#allocation2], %s427_s20 }
  0x38   : > { %608 = dma.done.wait (%p712_p8), %s184_s27, 384  }
  0x39   : > { %610 = vsyncadd (%p712_p8), %s184_s27, 4294966912  ;;  %s428_s28 = smul.u32 6, %s773_s25  ;;  %s193_s18 = scalar_lea.sflag [#allocation6], %s773_s25 }
  0x3b   : > { %s196_s19 = scalar_lea.vmem [#allocation5], %s428_s28 }
  0x3c   : > { %612 = dma.done.wait (%p712_p8), %s193_s18, 96  }
  0x3d   : > { %614 = vsyncadd (%p712_p8), %s193_s18, 4294967200  ;;  %v222_v0 = vld [vmem:[%s196_s19] sm:$0x3]  ;;  %v405_v1 = vld [vmem:[%s196_s19 + $0x2] sm:$0x3]  ;;  %s221_s21 = scalar_lea.vmem [#allocation7], %s428_s28 }
  0x3e   : > { %v406_v2 = vld [vmem:[%s196_s19 + $0x4] sm:$0x3]  ;;  %v227_v3 = vld [vmem:[%s777_s29] sm:$0x3]  ;;  %v408_v5 = vld [vmem:[%s777_s29 + $0x4] sm:$0x3] }
  0x3f   : > { %v407_v4 = vld [vmem:[%s777_s29 + $0x2] sm:$0x3]  ;;  %v228_v6 = vmul.f32 %v227_v3, %v222_v0  ;;  %v235_v8 = vmul.f32 %v408_v5, %v406_v2  ;;  %v410_v9 = vld [vmem:[%s777_s29 + $0x8] sm:$0x3]  ;;  %v411_v10 = vld [vmem:[%s777_s29 + $0xa] sm:$0x3] }
  0x40   : > { %v231_v7 = vmul.f32 %v407_v4, %v405_v1  ;;  %v243_v11 = vmul.f32 %v410_v9, %v222_v0  ;;  %v246_v12 = vmul.f32 %v411_v10, %v405_v1  ;;  %v412_v13 = vld [vmem:[%s777_s29 + $0xc] sm:$0x3]  ;;  %v415_v14 = vld [vmem:[%s777_s29 + $0x10] sm:$0x3]  ;;  %v416_v18 = vld [vmem:[%s777_s29 + $0x12] sm:$0x3] }
  0x41   : > { %v250_v16 = vmul.f32 %v412_v13, %v406_v2  ;;  %v259_v17 = vmul.f32 %v415_v14, %v222_v0  ;;  %v417_v19 = vld [vmem:[%s777_s29 + $0x14] sm:$0x3]  ;;  %v409_v20 = vld [vmem:[%s777_s29 + $0x6] sm:$0x3]  ;;  %v262_v22 = vmul.f32 %v416_v18, %v405_v1  ;;  %v413_v25 = vld [vmem:[%s777_s29 + $0xe] sm:$0x3] }
  0x42   : > { %v232_v15 = vadd.f32 %v231_v7, %v228_v6  ;;  %v247_v21 = vadd.f32 %v246_v12, %v243_v11  ;;  %v266_v23 = vmul.f32 %v417_v19, %v406_v2  ;;  %s288_s26 = sshll.u32 %s221_s21, 4  ;;  %s429_s30 = smul.u32 96, %s633_s12  ;;  %v418_v29 = vld [vmem:[%s777_s29 + $0x16] sm:$0x3]  ;;  %s806_s26 = int_to_ptr.vmem [resolvable:$true] %s288_s26 }
  0x43   : > { %v263_v27 = vadd.f32 %v262_v22, %v259_v17  ;;  %s274_s15 = scalar_lea.sflag [#allocation4], %s773_s25  ;;  %s557_s12 = scalar_lea.vmem %s806_s26, 96 }
  0x44   : > { %v236_v24 = vadd.f32 %v235_v8, %v232_v15  ;;  %v251_v26 = vadd.f32 %v250_v16, %v247_v21  ;;  %s811_s8 = scalar_lea.hbm %s861_s2, %s429_s30  ;;  %p558_p8 = scmp.ne.s32.totalorder %s806_s26, %s557_s12 }
  0x45   : > { %v267_v31 = vadd.f32 %v266_v23, %v263_v27  ;;  %s647_s16 = smov [#allocation7]  }
  0x46   : > { %v239_v28 = vadd.f32 %v409_v20, %v236_v24  ;;  %v254_v30 = vadd.f32 %v413_v25, %v251_v26  ;;  %p559_p0 = pnand %p558_p8, %p716_p9  ;;  %s561_s3 = sshll.u32 %s647_s16, 4  ;;  %s562_s3 = int_to_ptr.vmem [resolvable:$false] %s561_s3 }
  0x47   : > { %v270_v32 = vadd.f32 %v418_v29, %v267_v31  ;;  %s563_s5 = scalar_lea.vmem %s562_s3, 192  ;;  %p564_p4 = scmp.lt.s32.totalorder %s806_s26, %s562_s3 }
  0x48   : > { %240 = vst [vmem:[%s221_s21] sm:$0x3] %v239_v28  ;;  %414 = vst [vmem:[%s221_s21 + $0x2] sm:$0x3] %v254_v30  ;;  %p560_p2 = pneg %p559_p0  ;;  %p565_p5 = scmp.lt.s32.totalorder %s563_s5, %s557_s12 }
  0x49   : > { %419 = vst [vmem:[%s221_s21 + $0x4] sm:$0x3] %v270_v32 }
  0x4a   : > { %p566_p6 = por %p565_p5, %p564_p4 }
  0x4c   : > { %p567_p7 = pnand %p566_p6, %p560_p2 }
  0x4e   : > { %570 = shalt.err (!%p567_p7)
}
  0x4f   : > { %s571_s6 = scalar_lea.hbm %s811_s8, 96  ;;  %s575_s29 = scalar_lea.hbm %s861_s2, 192 }
  0x50   : > { %p572_p1 = scmp.ne.s32.totalorder %s811_s8, %s571_s6  ;;  %p576_p3 = scmp.lt.s32.totalorder %s811_s8, %s861_s2 }
  0x51   : > { %p577_p8 = scmp.lt.s32.totalorder %s575_s29, %s571_s6 }
  0x52   : > { %p573_p10 = pnand %p572_p1, %p716_p9 }
  0x53   : > { %p578_p0 = por %p577_p8, %p576_p3 }
  0x54   : > { %p574_p13 = pneg %p573_p10 }
  0x56   : > { %p579_p2 = pnand %p578_p0, %p574_p13 }
  0x58   : > { %582 = shalt.err (!%p579_p2)
}
  0x59   : > { %s648_s19 = smov 32   ;;  %s649_s21 = smov 2  }
  0x5a   : > { %434 = dma.vmem_to_hbm [thread:$0]  (%p716_p9), %s806_s26, 96, %s811_s8, %s274_s15, %s648_s19, %s648_s19, %s649_s21  }
  0x5b PF: > { %s303_s30 = sand.u32 1, %s621_s9   ;;  %p444_p4 = pnand %p401_p12, %p723_p11 }
  0x5c   : > { %s304_s4 = scalar_lea.sflag [#allocation4], %s303_s30 }
  0x5d   : > { %p445_p5 = pneg %p444_p4 }
  0x5f   : > { %616 = dma.done.wait (%p445_p5), %s304_s4, 96  }
  0x60   : > { %618 = vsyncadd (%p445_p5), %s304_s4, 4294967200  ;;  %s21_s14 = sadd.s32 1, %s641_s14   ;;  %s868_s9 = smov %s625_s10 }
  0x61   : > { %p18_p6 = scmp.ge.s32.totalorder %s21_s14, 4   ;;  %s869_s10 = smov %s629_s11 }
  0x62   : > { %s870_s11 = smov %s721_s23  ;;  %s871_s12 = smov %s637_s13 }
  0x63   : > { %s872_s13 = smov %s874_s17  ;;  %20 = sbr.rel (!%p18_p6) target bundleno = 8 (0x8), region = 101 }
  0x68   :  { %309 = vsyncpa [#allocation3], 1 }
  0x69   :  { %311 = vsyncpa [#allocation3 + $0x1], 1 }
  0x6a   :  { %312 = vsyncpa [#allocation6], 1 }
  0x6b   :  { %314 = vsyncpa [#allocation6 + $0x1], 1 }
  0x6c   :  { %315 = vsyncpa [#allocation4], 1 }
  0x6d   :  { %317 = vsyncpa [#allocation4 + $0x1], 1 }

</bundles_post_ra>
